<compile_context>
chip_gen: v7x
topology: tpu7x:2x2x1
jax: 0.10.0
libtpu: 0.0.40
codegen_flags: <defaults>
</compile_context>

<pallas_src>
import functools

import jax
import jax.numpy as jnp
from jax.experimental import pallas as pl
from jax.experimental.pallas import tpu as pltpu


def _extended_kernel(x_ref, c_ref, other_ref, h_ref,
                     k1_ref, k2_ref, b_ref, k1at_ref, out_ref):
    """out = other + ((sigmoid(x@K1 + c@K2 + b) * a) @ K1.T) * h.

    All row-tiled operands are in 'folded' layout (F batch rows packed along
    lanes); the weights were pre-expanded to block-diagonal form so the math
    is identical and no in-kernel relayout is needed.
    """
    mxu = k1_ref.dtype
    z = (jnp.dot(x_ref[...].astype(mxu), k1_ref[...],
                 preferred_element_type=jnp.float32)
         + jnp.dot(c_ref[...].astype(mxu), k2_ref[...],
                   preferred_element_type=jnp.float32)
         + b_ref[...])                                        # [TBf, F*width] f32
    # sigmoid(z) = 1 / (1 + exp(-z)); approx reciprocal uses the EUP slot.
    g = pl.reciprocal(1.0 + jnp.exp(-z), approx=True)         # f32
    gradH = jnp.dot(g.astype(mxu), k1at_ref[...],
                    preferred_element_type=jnp.float32)        # [TBf, F*d]
    out_ref[...] = other_ref[...] + gradH * h_ref[0, 0]        # h: SMEM scalar


@functools.partial(jax.jit,
                   static_argnames=("mode", "block_rows", "mxu_dtype"))
def extended_module_forward(p, q, c, h, params, mode="up",
                            block_rows=32768, mxu_dtype=jnp.bfloat16):
    """Pallas implementation of ExtendedModule.forward for pqch = (p, q, c, h)."""
    K1 = params["K1"].astype(jnp.float32)
    K2 = params["K2"].astype(jnp.float32)
    a = params["a"].reshape(1, -1).astype(jnp.float32)
    b = params["b"].reshape(-1).astype(jnp.float32)
    h2 = jnp.asarray(h, jnp.float32).reshape(1, 1)

    if mode == "up":
        x, other = q, p          # gradH from q; update p
    elif mode == "low":
        x, other = p, q          # gradH from p; update q
    else:
        raise ValueError(mode)

    x = x.astype(jnp.float32)
    other = other.astype(jnp.float32)
    c32 = c.astype(jnp.float32)

    B, d = other.shape
    dc = c32.shape[1]
    width = K1.shape[1]

    if dc == 0:                  # degenerate dim == latent_dim case
        c32 = jnp.zeros((B, 1), jnp.float32)
        K2 = jnp.zeros((1, width), jnp.float32)
        dc = 1

    # Fold factor: pack F batch rows onto the lane axis (zero-copy reshapes)
    # so x / other / out are 128-lane dense. Fallback F = 1 stays correct.
    if 0 < d <= 128 and 128 % d == 0 and B % (128 // d) == 0:
        F = 128 // d
    else:
        F = 1

    Bf = B // F
    K1aT = (K1 * a).T                                   # (width, d), 'a' folded in
    if F > 1:
        eyeF = jnp.eye(F, dtype=jnp.float32)
        K1w = jnp.kron(eyeF, K1)                        # (F*d,     F*width)
        K2w = jnp.kron(eyeF, K2)                        # (F*dc,    F*width)
        K1aTw = jnp.kron(eyeF, K1aT)                    # (F*width, F*d)
        bw = jnp.tile(b, F).reshape(1, F * width)
    else:
        K1w, K2w, K1aTw, bw = K1, K2, K1aT, b.reshape(1, width)

    K1w = K1w.astype(mxu_dtype)
    K2w = K2w.astype(mxu_dtype)
    K1aTw = K1aTw.astype(mxu_dtype)

    xf = x.reshape(Bf, F * d)            # zero-copy
    cf = c32.reshape(Bf, F * dc)         # zero-copy
    otherf = other.reshape(Bf, F * d)    # zero-copy

    # Batch tile in folded rows: sublane-friendly, VMEM-safe, and >= 2 grid
    # steps when there is enough work (so both v7x TensorCores get a share).
    tbf = min(Bf, max(1, block_rows // F))
    if tbf == Bf and Bf >= 16:
        tbf = pl.cdiv(Bf, 2)
    if tbf >= 8:
        tbf = min(Bf, ((tbf + 7) // 8) * 8)
    if tbf < 8:
        tbf = min(Bf, 8)
    grid = (pl.cdiv(Bf, tbf),)

    out = pl.pallas_call(
        _extended_kernel,
        out_shape=jax.ShapeDtypeStruct((Bf, F * d), jnp.float32),
        grid=grid,
        in_specs=[
            pl.BlockSpec((tbf, F * d), lambda i: (i, 0)),          # x     (tiled)
            pl.BlockSpec((tbf, F * dc), lambda i: (i, 0)),         # c     (tiled)
            pl.BlockSpec((tbf, F * d), lambda i: (i, 0)),          # other (tiled)
            pl.BlockSpec(memory_space=pltpu.MemorySpace.SMEM),     # h scalar
            pl.BlockSpec((F * d, F * width), lambda i: (0, 0)),    # K1  block-diag (resident)
            pl.BlockSpec((F * dc, F * width), lambda i: (0, 0)),   # K2  block-diag (resident)
            pl.BlockSpec((1, F * width), lambda i: (0, 0)),        # b             (resident)
            pl.BlockSpec((F * width, F * d), lambda i: (0, 0)),    # (K1*a).T b-d  (resident)
        ],
        out_specs=pl.BlockSpec((tbf, F * d), lambda i: (i, 0)),
        compiler_params=pltpu.CompilerParams(
            dimension_semantics=("parallel",),
            vmem_limit_bytes=32 * 1024 * 1024),
    )(xf, cf, otherf, h2, K1w, K2w, bw, K1aTw)

    out = out.reshape(B, d)              # zero-copy unfold
    if mode == "up":
        return (out, q, c)
    return (p, out, c)


if __name__ == "__main__":
    # Small shapes consistent with the module: dim=24, latent_dim=16, width=32
    # => d = 8, dc = 8.  B=512 with block_rows=128 gives a 4-step folded grid.
    dim, latent_dim, width = 24, 16, 32
    d, dc = latent_dim // 2, dim - latent_dim
    B = 512

    key = jax.random.PRNGKey(0)
    kp, kq, kc, k1, k2, k3 = jax.random.split(key, 6)
    p = jax.random.normal(kp, (B, d), jnp.float32)
    q = jax.random.normal(kq, (B, d), jnp.float32)
    c = jax.random.normal(kc, (B, dc), jnp.float32)
    h = jnp.float32(0.1)

    params = {
        "K1": jax.random.normal(k1, (d, width), jnp.float32) * 0.01,
        "K2": jax.random.normal(k2, (dc, width), jnp.float32) * 0.01,
        "a": jax.random.normal(k3, (width,), jnp.float32) * 0.01,
        "b": jnp.zeros((width,), jnp.float32),
    }

    # Reference in plain JAX (same math as the PyTorch forward).
    def ref(p, q, c, h, params, mode):
        K1, K2 = params["K1"], params["K2"]
        a, b = params["a"], params["b"]
        x = q if mode == "up" else p
        gradH = (jax.nn.sigmoid(x @ K1 + c @ K2 + b) * a) @ K1.T
        if mode == "up":
            return (p + gradH * h, q, c)
        return (p, q + gradH * h, c)

    # Folded path (F = 16), both modes, 4-step grid.
    p_up, q_up, c_up = extended_module_forward(p, q, c, h, params,
                                               mode="up", block_rows=128)
    p_lo, q_lo, c_lo = extended_module_forward(p, q, c, h, params,
                                               mode="low", block_rows=128)
    jax.block_until_ready((p_up, q_up, c_up, p_lo, q_lo, c_lo))

    r_up = ref(p, q, c, h, params, "up")
    r_lo = ref(p, q, c, h, params, "low")
    assert jnp.allclose(p_up, r_up[0], atol=1e-4, rtol=1e-4)
    assert jnp.allclose(q_lo, r_lo[1], atol=1e-4, rtol=1e-4)
    assert jnp.allclose(q_up, q) and jnp.allclose(c_up, c)
    assert jnp.allclose(p_lo, p) and jnp.allclose(c_lo, c)

    # Fallback path (B not divisible by the fold factor -> F = 1).
    B2 = 100
    p2 = jax.random.normal(kp, (B2, d), jnp.float32)
    q2 = jax.random.normal(kq, (B2, d), jnp.float32)
    c2 = jax.random.normal(kc, (B2, dc), jnp.float32)
    p2u, q2u, c2u = extended_module_forward(p2, q2, c2, h, params, mode="up")
    jax.block_until_ready((p2u, q2u, c2u))
    r2 = ref(p2, q2, c2, h, params, "up")
    assert jnp.allclose(p2u, r2[0], atol=1e-4, rtol=1e-4)
    assert jnp.allclose(q2u, q2) and jnp.allclose(c2u, c2)

    print("KERNEL_OK")
</pallas_src>

<mosaic_0001>
module attributes {stable_mosaic.version = 11 : i64} {
  func.func @_extended_kernel(%arg0: i32, %arg1: memref<8x128xf32, #tpu.memory_space<vmem>>, %arg2: memref<8x128xf32, #tpu.memory_space<vmem>>, %arg3: memref<8x128xf32, #tpu.memory_space<vmem>>, %arg4: memref<1x1xf32, #tpu.memory_space<smem>>, %arg5: memref<128x512xbf16, #tpu.memory_space<vmem>>, %arg6: memref<128x512xbf16, #tpu.memory_space<vmem>>, %arg7: memref<1x512xf32, #tpu.memory_space<vmem>>, %arg8: memref<512x128xbf16, #tpu.memory_space<vmem>>, %arg9: memref<8x128xf32, #tpu.memory_space<vmem>>) attributes {dimension_semantics = [#tpu.dimension_semantics<parallel>], iteration_bounds = array<i64: 4>, scalar_prefetch = 0 : i64, scratch_operands = 0 : i64, tpu.core_type = #tpu.core_type<tc>, window_params = [{transform_indices = @transform_0, window_bounds = array<i64: 8, 128>}, {transform_indices = @transform_1, window_bounds = array<i64: 8, 128>}, {transform_indices = @transform_2, window_bounds = array<i64: 8, 128>}, {transform_indices = @transform_3, window_bounds = array<i64: 1, 1>}, {pipeline_mode = #tpu.pipeline_mode<synchronous>, transform_indices = @transform_4, window_bounds = array<i64: 128, 512>}, {pipeline_mode = #tpu.pipeline_mode<synchronous>, transform_indices = @transform_5, window_bounds = array<i64: 128, 512>}, {pipeline_mode = #tpu.pipeline_mode<synchronous>, transform_indices = @transform_6, window_bounds = array<i64: 1, 512>}, {pipeline_mode = #tpu.pipeline_mode<synchronous>, transform_indices = @transform_7, window_bounds = array<i64: 512, 128>}, {transform_indices = @transform_8, window_bounds = array<i64: 8, 128>}]} {
    %c0 = arith.constant 0 : index
    %c0_0 = arith.constant 0 : index
    %0 = vector.load %arg1[%c0, %c0_0] : memref<8x128xf32, #tpu.memory_space<vmem>>, vector<8x128xf32>
    %1 = arith.truncf %0 : vector<8x128xf32> to vector<8x128xbf16>
    %c0_1 = arith.constant 0 : index
    %c0_2 = arith.constant 0 : index
    %2 = vector.load %arg5[%c0_1, %c0_2] : memref<128x512xbf16, #tpu.memory_space<vmem>>, vector<128x512xbf16>
    %cst = arith.constant dense<0.000000e+00> : vector<8x512xf32>
    %3 = tpu.matmul %1, %2, %cst {dimension_numbers = #tpu.dot_dimension_numbers<[1], [0], [0], [1], [0, 0, 1, 1], [], []>} : vector<8x128xbf16>, vector<128x512xbf16>, vector<8x512xf32> -> vector<8x512xf32>
    %c0_3 = arith.constant 0 : index
    %c0_4 = arith.constant 0 : index
    %4 = vector.load %arg2[%c0_3, %c0_4] : memref<8x128xf32, #tpu.memory_space<vmem>>, vector<8x128xf32>
    %5 = arith.truncf %4 : vector<8x128xf32> to vector<8x128xbf16>
    %c0_5 = arith.constant 0 : index
    %c0_6 = arith.constant 0 : index
    %6 = vector.load %arg6[%c0_5, %c0_6] : memref<128x512xbf16, #tpu.memory_space<vmem>>, vector<128x512xbf16>
    %cst_7 = arith.constant dense<0.000000e+00> : vector<8x512xf32>
    %7 = tpu.matmul %5, %6, %cst_7 {dimension_numbers = #tpu.dot_dimension_numbers<[1], [0], [0], [1], [0, 0, 1, 1], [], []>} : vector<8x128xbf16>, vector<128x512xbf16>, vector<8x512xf32> -> vector<8x512xf32>
    %8 = arith.addf %3, %7 : vector<8x512xf32>
    %c0_8 = arith.constant 0 : index
    %c0_9 = arith.constant 0 : index
    %9 = vector.load %arg7[%c0_8, %c0_9] : memref<1x512xf32, #tpu.memory_space<vmem>>, vector<1x512xf32>
    %10 = vector.broadcast %9 : vector<1x512xf32> to vector<8x512xf32>
    %11 = arith.addf %8, %10 : vector<8x512xf32>
    %cst_10 = arith.constant 0.000000e+00 : f32
    %12 = vector.broadcast %cst_10 : f32 to vector<8x512xf32>
    %13 = arith.subf %12, %11 : vector<8x512xf32>
    %14 = math.exp %13 : vector<8x512xf32>
    %cst_11 = arith.constant 1.000000e+00 : f32
    %15 = vector.broadcast %cst_11 : f32 to vector<8x512xf32>
    %16 = arith.addf %15, %14 : vector<8x512xf32>
    %17 = tpu.reciprocal %16 {approx = true} : vector<8x512xf32> -> vector<8x512xf32>
    %18 = arith.truncf %17 : vector<8x512xf32> to vector<8x512xbf16>
    %c0_12 = arith.constant 0 : index
    %c0_13 = arith.constant 0 : index
    %19 = vector.load %arg8[%c0_12, %c0_13] : memref<512x128xbf16, #tpu.memory_space<vmem>>, vector<512x128xbf16>
    %cst_14 = arith.constant dense<0.000000e+00> : vector<8x128xf32>
    %20 = tpu.matmul %18, %19, %cst_14 {dimension_numbers = #tpu.dot_dimension_numbers<[1], [0], [0], [1], [0, 0, 1, 1], [], []>} : vector<8x512xbf16>, vector<512x128xbf16>, vector<8x128xf32> -> vector<8x128xf32>
    %c0_15 = arith.constant 0 : index
    %c0_16 = arith.constant 0 : index
    %21 = vector.load %arg3[%c0_15, %c0_16] : memref<8x128xf32, #tpu.memory_space<vmem>>, vector<8x128xf32>
    %c0_17 = arith.constant 0 : index
    %c0_18 = arith.constant 0 : index
    %22 = memref.load %arg4[%c0_17, %c0_18] : memref<1x1xf32, #tpu.memory_space<smem>>
    %23 = vector.broadcast %22 : f32 to vector<8x128xf32>
    %24 = arith.mulf %20, %23 : vector<8x128xf32>
    %25 = arith.addf %21, %24 : vector<8x128xf32>
    %c0_19 = arith.constant 0 : index
    %c0_20 = arith.constant 0 : index
    %26 = vector.load %arg9[%c0_19, %c0_20] : memref<8x128xf32, #tpu.memory_space<vmem>>, vector<8x128xf32>
    tpu.vector_store %arg9[%c0_19, %c0_20], %25 {strides = array<i32>} : memref<8x128xf32, #tpu.memory_space<vmem>>, vector<8x128xf32>,
    return
  }
  func.func @transform_0(%arg0: i32) -> (i32, i32) {
    %c0_i32 = arith.constant 0 : i32
    %c0_i32_0 = arith.constant 0 : i32
    return %arg0, %c0_i32 : i32, i32
  }
  func.func @transform_1(%arg0: i32) -> (i32, i32) {
    %c0_i32 = arith.constant 0 : i32
    %c0_i32_0 = arith.constant 0 : i32
    return %arg0, %c0_i32 : i32, i32
  }
  func.func @transform_2(%arg0: i32) -> (i32, i32) {
    %c0_i32 = arith.constant 0 : i32
    %c0_i32_0 = arith.constant 0 : i32
    return %arg0, %c0_i32 : i32, i32
  }
  func.func @transform_3(%arg0: i32) -> (i32, i32) {
    %c0_i32 = arith.constant 0 : i32
    %c0_i32_0 = arith.constant 0 : i32
    %c0_i32_1 = arith.constant 0 : i32
    return %c0_i32, %c0_i32_0 : i32, i32
  }
  func.func @transform_4(%arg0: i32) -> (i32, i32) {
    %c0_i32 = arith.constant 0 : i32
    %c0_i32_0 = arith.constant 0 : i32
    %c0_i32_1 = arith.constant 0 : i32
    return %c0_i32, %c0_i32_0 : i32, i32
  }
  func.func @transform_5(%arg0: i32) -> (i32, i32) {
    %c0_i32 = arith.constant 0 : i32
    %c0_i32_0 = arith.constant 0 : i32
    %c0_i32_1 = arith.constant 0 : i32
    return %c0_i32, %c0_i32_0 : i32, i32
  }
  func.func @transform_6(%arg0: i32) -> (i32, i32) {
    %c0_i32 = arith.constant 0 : i32
    %c0_i32_0 = arith.constant 0 : i32
    %c0_i32_1 = arith.constant 0 : i32
    return %c0_i32, %c0_i32_0 : i32, i32
  }
  func.func @transform_7(%arg0: i32) -> (i32, i32) {
    %c0_i32 = arith.constant 0 : i32
    %c0_i32_0 = arith.constant 0 : i32
    %c0_i32_1 = arith.constant 0 : i32
    return %c0_i32, %c0_i32_0 : i32, i32
  }
  func.func @transform_8(%arg0: i32) -> (i32, i32) {
    %c0_i32 = arith.constant 0 : i32
    %c0_i32_0 = arith.constant 0 : i32
    return %arg0, %c0_i32 : i32, i32
  }
}

</mosaic_0001>

<bundles_post_ra>
// kernel: tile.8
= control target key start
LH: loop header
LB: loop body
LE: loop exit
PB: predicated region body
PF: predicated region fallthrough
CT: control target
= control target key end

     0   :  { %s28_s0 = inlined_call_operand.vmem [shape: f32[32], index: 0, kind: input, shape index: {}]   ;;  %s29_s1 = inlined_call_operand.vmem [shape: f32[16,32], index: 1, kind: output, shape index: {}]  }
   0x1   :  { %v4_v0 = vld [vmem:[%s28_s0] ss:$0 sm:$0xff] }
   0x2   :  { %5 = vst [vmem:[%s29_s1] sm:$0xff] %v4_v0  ;;  %8 = vst [vmem:[%s29_s1 + $0x8] sm:$0xff] %v4_v0 }

// kernel: tile.9
= control target key start
LH: loop header
LB: loop body
LE: loop exit
PB: predicated region body
PF: predicated region fallthrough
CT: control target
= control target key end

     0   :  { %s57_s8 = smov 96   ;;  %vm3_vm0 = vcmask 261120   ;;  %s59_s15 = smov 64   ;;  %vm9_vm1 = vcmask 1048320   ;;  %vm15_vm2 = vcmask 785920   ;;  %vm21_vm3 = vcmask 523520   ;;  %s94_s0 = inlined_call_operand.vmem [shape: f32[16,32], index: 0, kind: input, shape index: {}]   ;;  %s95_s1 = inlined_call_operand.vmem [shape: f32[1,512], index: 1, kind: output, shape index: {}]  }
   0x1   :  { %v48_v0 = vld [vmem:[%s94_s0 + $0x3] ss:$4 sm:$0xf]   ;;  %v49_v1 = vld [vmem:[%s94_s0 + $0x2] ss:$4 sm:$0xf]  }
   0x2   :  { %7 = vrot.lane.b32.xlu0 %v48_v0, %s57_s8  ;;  %v50_v2 = vld [vmem:[%s94_s0 + $0x1] ss:$4 sm:$0xf]   ;;  %v2_v3 = vld [vmem:[%s94_s0] ss:$4 sm:$0xf]  }
   0x3   :  { %s58_s0 = smov 32   ;;  %4 = vst.msk [vmem:[#allocation0] ss:$8 sm:$0xf] %vm3_vm0, %v2_v3  }
   0x4   :  { %19 = vrot.lane.b32.xlu1 %v50_v2, %s58_s0 }
   0x6   :  { %13 = vrot.lane.b32.xlu0 %v49_v1, %s59_s15 }
  0x74   :  { %v8_v4 = vpop.permute.xlu0 %7  }
  0x75   :  { %10 = vst.msk [vmem:[#allocation0] ss:$8 sm:$0xf] %vm9_vm1, %v8_v4  }
  0x76   :  { %v20_v5 = vpop.permute.xlu1 %19  }
  0x78   :  { %v14_v6 = vpop.permute.xlu0 %13  }
  0x79   :  { %16 = vst.msk [vmem:[#allocation0] ss:$8 sm:$0xf] %vm15_vm2, %v14_v6  }
  0x7a   :  { %22 = vst.msk [vmem:[#allocation0] ss:$8 sm:$0xf] %vm21_vm3, %v20_v5  }
  0x81   :  { %v26_v7 = vld [vmem:[#allocation0] sm:$0x1]  ;;  %v30_v8 = vld [vmem:[#allocation0 + $0x8] sm:$0x1]  ;;  %v35_v9 = vld [vmem:[#allocation0 + $0x10] sm:$0x1] }
  0x82   :  { %28 = vst [vmem:[%s95_s1] sm:$0x1] %v26_v7  ;;  %51 = vst [vmem:[%s95_s1 + $0x1] sm:$0x1] %v30_v8  ;;  %v41_v10 = vld [vmem:[#allocation0 + $0x18] sm:$0x1] }
  0x83   :  { %52 = vst [vmem:[%s95_s1 + $0x2] sm:$0x1] %v35_v9  ;;  %53 = vst [vmem:[%s95_s1 + $0x3] sm:$0x1] %v41_v10 }

// kernel: extended_module_forward.1
= control target key start
LH: loop header
LB: loop body
LE: loop exit
PB: predicated region body
PF: predicated region fallthrough
CT: control target
= control target key end

     0   :  { %s1719_s29 = smov 0   ;;  %s2047_s0 = inlined_call_operand.vmem [shape: f32[32,128], index: 0, kind: input, shape index: {}]   ;;  %s2048_s1 = inlined_call_operand.vmem [shape: f32[32,128], index: 1, kind: input, shape index: {}]   ;;  %s2049_s2 = inlined_call_operand.vmem [shape: f32[32,128], index: 2, kind: input, shape index: {}]   ;;  %s2050_s3 = inlined_call_operand.<no memory space> [shape: f32[1,1], index: 3, kind: input, shape index: {}]   ;;  %s2051_s4 = inlined_call_operand.vmem [shape: bf16[128,512], index: 4, kind: input, shape index: {}]   ;;  %s2052_s5 = inlined_call_operand.vmem [shape: bf16[128,512], index: 5, kind: input, shape index: {}]   ;;  %s2053_s6 = inlined_call_operand.vmem [shape: f32[1,512], index: 6, kind: input, shape index: {}]   ;;  %s2054_s7 = inlined_call_operand.vmem [shape: bf16[512,128], index: 7, kind: input, shape index: {}]   ;;  %s2055_s8 = inlined_call_operand.vmem [shape: f32[32,128], index: 8, kind: output, shape index: {}]  }
   0x1   :  { %13 = sst [smem:[#allocation2]] %s2050_s3 }
   0x2 LB: > { %s1358_s30 = sadd.s32 4294967295, %s1668_s29   ;;  %p1362_p0 = scmp.ge.s32.totalorder %s1668_s29, 1  ;;  %s1668_s29 = sphi %s1719_s29, %s19_s29  }
   0x3   : > { %p280_p1 = scmp.lt.s32.totalorder %s1668_s29, 5 }
   0x5   : > { %p281_p2 = pnand %p1362_p0, %p280_p1 }
   0x6   : > { %v1518_v0 = vld [vmem:[%s2052_s5 + $0x4] ss:$16 sps:$4 sm:$0xff] (!%p281_p2)   ;;  %v1520_v1 = vld [vmem:[%s2052_s5 + $0xc] ss:$16 sps:$4 sm:$0xff] (!%p281_p2)   ;;  %v1670_v2 = vmov (!%p281_p2), 0   ;;  %p320_p3 = scmp.lt.s32.totalorder (!%p281_p2), %s1358_s30, 3 }
   0x7   : > { %284 = sbr.rel (%p281_p2) target bundleno = 544 (0x220), region = 52  ;;  %597 = vmatprep.mubr.bf16.mxu0 (!%p281_p2), %v1670_v2  ;;  %638 = vmatprep.mubr.bf16.mxu1 (!%p281_p2), %v1670_v2  ;;  %v1522_v3 = vld [vmem:[%s2052_s5] ss:$16 sps:$4 sm:$0xff] (!%p281_p2)   ;;  %v1523_v4 = vld [vmem:[%s2052_s5 + $0x8] ss:$16 sps:$4 sm:$0xff] (!%p281_p2)   ;;  %s1276_s20 = sld [smem:[#allocation2]] (!%p281_p2) }
   0x8   : > { %565 = vmatprep.subr.bf16.mxu0 (!%p281_p2), %v1518_v0  ;;  %606 = vmatprep.subr.bf16.mxu1 (!%p281_p2), %v1520_v1  ;;  %v1524_v5 = vld [vmem:[%s2052_s5 + $0x24] ss:$16 sps:$4 sm:$0xff] (!%p281_p2)   ;;  %v1526_v6 = vld [vmem:[%s2052_s5 + $0x2c] ss:$16 sps:$4 sm:$0xff] (!%p281_p2)   ;;  %v1528_v7 = vld [vmem:[%s2052_s5 + $0x20] ss:$16 sps:$4 sm:$0xff] (!%p281_p2)  }
   0x9   : > { %566 = vmatpush1.bf16.msra.mxu0 (!%p281_p2), %v1522_v3  ;;  %607 = vmatpush1.bf16.msra.mxu1 (!%p281_p2), %v1523_v4  ;;  %v1529_v8 = vld [vmem:[%s2052_s5 + $0x28] ss:$16 sps:$4 sm:$0xff] (!%p281_p2)   ;;  %v1530_v9 = vld [vmem:[%s2052_s5 + $0x44] ss:$16 sps:$4 sm:$0xff] (!%p281_p2)   ;;  %v1532_v10 = vld [vmem:[%s2052_s5 + $0x4c] ss:$16 sps:$4 sm:$0xff] (!%p281_p2)  }
   0xa   : > { %567 = vmatprep.subr.bf16.mxu0 (!%p281_p2), %v1524_v5  ;;  %608 = vmatprep.subr.bf16.mxu1 (!%p281_p2), %v1526_v6  ;;  %v1534_v11 = vld [vmem:[%s2052_s5 + $0x40] ss:$16 sps:$4 sm:$0xff] (!%p281_p2)   ;;  %v1535_v12 = vld [vmem:[%s2052_s5 + $0x48] ss:$16 sps:$4 sm:$0xff] (!%p281_p2)   ;;  %v1536_v13 = vld [vmem:[%s2052_s5 + $0x64] ss:$16 sps:$4 sm:$0xff] (!%p281_p2)  }
   0xb   : > { %v1538_v14 = vld [vmem:[%s2052_s5 + $0x6c] ss:$16 sps:$4 sm:$0xff] (!%p281_p2)   ;;  %v1540_v15 = vld [vmem:[%s2052_s5 + $0x60] ss:$16 sps:$4 sm:$0xff] (!%p281_p2)   ;;  %v1541_v16 = vld [vmem:[%s2052_s5 + $0x68] ss:$16 sps:$4 sm:$0xff] (!%p281_p2)  }
   0xc   : > { %v1542_v17 = vld [vmem:[%s2052_s5 + $0x84] ss:$16 sps:$4 sm:$0xff] (!%p281_p2)   ;;  %v1544_v18 = vld [vmem:[%s2052_s5 + $0x8c] ss:$16 sps:$4 sm:$0xff] (!%p281_p2)   ;;  %v1546_v19 = vld [vmem:[%s2052_s5 + $0x80] ss:$16 sps:$4 sm:$0xff] (!%p281_p2)  }
   0xd   : > { %568 = vmatpush1.bf16.msra.mxu0 (!%p281_p2), %v1528_v7  ;;  %609 = vmatpush1.bf16.msra.mxu1 (!%p281_p2), %v1529_v8  ;;  %v1547_v20 = vld [vmem:[%s2052_s5 + $0x88] ss:$16 sps:$4 sm:$0xff] (!%p281_p2)   ;;  %v1548_v21 = vld [vmem:[%s2052_s5 + $0xa4] ss:$16 sps:$4 sm:$0xff] (!%p281_p2)   ;;  %v1550_v22 = vld [vmem:[%s2052_s5 + $0xac] ss:$16 sps:$4 sm:$0xff] (!%p281_p2)  }
   0xe   : > { %569 = vmatprep.subr.bf16.mxu0 %v1530_v9  ;;  %610 = vmatprep.subr.bf16.mxu1 %v1532_v10  ;;  %s2057_s30 = smov (!%p320_p3, %s1358_s30), 3  ;;  %v1552_v23 = vld [vmem:[%s2052_s5 + $0xa0] ss:$16 sps:$4 sm:$0xff]   ;;  %v1553_v24 = vld [vmem:[%s2052_s5 + $0xa8] ss:$16 sps:$4 sm:$0xff]  }
   0xf   : > { %v1554_v25 = vld [vmem:[%s2052_s5 + $0xc4] ss:$16 sps:$4 sm:$0xff]   ;;  %v1556_v26 = vld [vmem:[%s2052_s5 + $0xcc] ss:$16 sps:$4 sm:$0xff]   ;;  %s1811_s18 = sshll.u32 %s2057_s30, 3 }
  0x10   : > { %v1558_v27 = vld [vmem:[%s2052_s5 + $0xc0] ss:$16 sps:$4 sm:$0xff]   ;;  %v1559_v28 = vld [vmem:[%s2052_s5 + $0xc8] ss:$16 sps:$4 sm:$0xff]   ;;  %v1560_v29 = vld [vmem:[%s2052_s5 + $0xe4] ss:$16 sps:$4 sm:$0xff]   ;;  %s327_s28 = scalar_lea.vmem %s2048_s1, %s1811_s18  ;;  %s323_s11 = scalar_lea.vmem %s2047_s0, %s1811_s18 }
  0x11   : > { %570 = vmatpush1.bf16.msra.mxu0 %v1534_v11  ;;  %611 = vmatpush1.bf16.msra.mxu1 %v1535_v12  ;;  %v1562_v30 = vld [vmem:[%s2052_s5 + $0xec] ss:$16 sps:$4 sm:$0xff]   ;;  %v1564_v31 = vld [vmem:[%s2052_s5 + $0xe0] ss:$16 sps:$4 sm:$0xff]   ;;  %v1565_v32 = vld [vmem:[%s2052_s5 + $0xe8] ss:$16 sps:$4 sm:$0xff]   ;;  %s331_s23 = scalar_lea.vmem %s2049_s2, %s1811_s18  ;;  %s335_s30 = scalar_lea.vmem %s2055_s8, %s1811_s18 }
  0x12   : > { %571 = vmatprep.subr.bf16.mxu0 %v1536_v13  ;;  %612 = vmatprep.subr.bf16.mxu1 %v1538_v14  ;;  %v371_v33 = vld [vmem:[%s327_s28] sm:$0xff]  ;;  %v1571_v35 = vld [vmem:[%s2051_s4 + $0xc] ss:$16 sps:$4 sm:$0xff]   ;;  %v1569_v38 = vld [vmem:[%s2051_s4 + $0x8] ss:$16 sps:$4 sm:$0xff]  }
  0x13   : > { %v1568_v34 = vld [vmem:[%s2051_s4 + $0x4] ss:$16 sps:$4 sm:$0xff]   ;;  %v372_v36 = vpack.c.bf16 %v371_v33, %v371_v33  ;;  %v1566_v37 = vld [vmem:[%s2051_s4] ss:$16 sps:$4 sm:$0xff]   ;;  %v1577_v40 = vld [vmem:[%s2051_s4 + $0x2c] ss:$16 sps:$4 sm:$0xff]  }
  0x14   : > { %v1574_v39 = vld [vmem:[%s2051_s4 + $0x24] ss:$16 sps:$4 sm:$0xff]   ;;  %v1572_v41 = vld [vmem:[%s2051_s4 + $0x20] ss:$16 sps:$4 sm:$0xff]   ;;  %v1575_v42 = vld [vmem:[%s2051_s4 + $0x28] ss:$16 sps:$4 sm:$0xff]  }
  0x15   : > { %572 = vmatpush1.bf16.msra.mxu0 %v1540_v15  ;;  %613 = vmatpush1.bf16.msra.mxu1 %v1541_v16  ;;  %v1580_v43 = vld [vmem:[%s2051_s4 + $0x44] ss:$16 sps:$4 sm:$0xff]   ;;  %v1583_v44 = vld [vmem:[%s2051_s4 + $0x4c] ss:$16 sps:$4 sm:$0xff]   ;;  %v1578_v45 = vld [vmem:[%s2051_s4 + $0x40] ss:$16 sps:$4 sm:$0xff]  }
  0x16   : > { %573 = vmatprep.subr.bf16.mxu0 %v1542_v17  ;;  %614 = vmatprep.subr.bf16.mxu1 %v1544_v18  ;;  %v1581_v46 = vld [vmem:[%s2051_s4 + $0x48] ss:$16 sps:$4 sm:$0xff]   ;;  %v1586_v47 = vld [vmem:[%s2051_s4 + $0x64] ss:$16 sps:$4 sm:$0xff]   ;;  %v1589_v48 = vld [vmem:[%s2051_s4 + $0x6c] ss:$16 sps:$4 sm:$0xff]  }
  0x17   : > { %v1584_v49 = vld [vmem:[%s2051_s4 + $0x60] ss:$16 sps:$4 sm:$0xff]   ;;  %v1587_v50 = vld [vmem:[%s2051_s4 + $0x68] ss:$16 sps:$4 sm:$0xff]   ;;  %v1592_v51 = vld [vmem:[%s2051_s4 + $0x84] ss:$16 sps:$4 sm:$0xff]  }
  0x18   : > { %v1595_v52 = vld [vmem:[%s2051_s4 + $0x8c] ss:$16 sps:$4 sm:$0xff]   ;;  %v1590_v53 = vld [vmem:[%s2051_s4 + $0x80] ss:$16 sps:$4 sm:$0xff]   ;;  %v1593_v54 = vld [vmem:[%s2051_s4 + $0x88] ss:$16 sps:$4 sm:$0xff]  }
  0x19   : > { %574 = vmatpush1.bf16.msra.mxu0 %v1546_v19  ;;  %615 = vmatpush1.bf16.msra.mxu1 %v1547_v20  ;;  %v1598_v55 = vld [vmem:[%s2051_s4 + $0xa4] ss:$16 sps:$4 sm:$0xff]   ;;  %v1601_v56 = vld [vmem:[%s2051_s4 + $0xac] ss:$16 sps:$4 sm:$0xff]   ;;  %v1596_v57 = vld [vmem:[%s2051_s4 + $0xa0] ss:$16 sps:$4 sm:$0xff]  }
  0x1a   : > { %575 = vmatprep.subr.bf16.mxu0 %v1548_v21  ;;  %616 = vmatprep.subr.bf16.mxu1 %v1550_v22  ;;  %v1599_v58 = vld [vmem:[%s2051_s4 + $0xa8] ss:$16 sps:$4 sm:$0xff]   ;;  %v1604_v59 = vld [vmem:[%s2051_s4 + $0xc4] ss:$16 sps:$4 sm:$0xff]   ;;  %v1607_v60 = vld [vmem:[%s2051_s4 + $0xcc] ss:$16 sps:$4 sm:$0xff]  }
  0x1b   : > { %v1602_v61 = vld [vmem:[%s2051_s4 + $0xc0] ss:$16 sps:$4 sm:$0xff]   ;;  %v1605_v62 = vld [vmem:[%s2051_s4 + $0xc8] ss:$16 sps:$4 sm:$0xff]   ;;  %v1610_v63 = vld [vmem:[%s2051_s4 + $0xe4] ss:$16 sps:$4 sm:$0xff]  }
  0x1c   : > { %v1613_v0 = vld [vmem:[%s2051_s4 + $0xec] ss:$16 sps:$4 sm:$0xff]   ;;  %v1608_v1 = vld [vmem:[%s2051_s4 + $0xe0] ss:$16 sps:$4 sm:$0xff]  }
  0x1d   : > { %576 = vmatpush1.bf16.msra.mxu0 %v1552_v23  ;;  %617 = vmatpush1.bf16.msra.mxu1 %v1553_v24  ;;  %v337_v3 = vld [vmem:[%s323_s11] sm:$0xff]  ;;  %v1618_v9 = vld [vmem:[%s2054_s7 + $0x48] sm:$0xff]   ;;  %v1622_v13 = vld [vmem:[%s2054_s7 + $0x50] sm:$0xff]  }
  0x1e   : > { %577 = vmatprep.subr.bf16.mxu0 %v1554_v25  ;;  %618 = vmatprep.subr.bf16.mxu1 %v1556_v26  ;;  %v338_v4 = vpack.c.bf16 %v337_v3, %v337_v3  ;;  %v1614_v5 = vld [vmem:[%s2054_s7 + $0x40] sm:$0xff]   ;;  %v1619_v10 = vld [vmem:[%s2054_s7 + $0xc8] sm:$0xff]   ;;  %v1623_v14 = vld [vmem:[%s2054_s7 + $0xd0] sm:$0xff]  }
  0x1f   : > { %v1615_v6 = vld [vmem:[%s2054_s7 + $0xc0] sm:$0xff]   ;;  %v1620_v11 = vld [vmem:[%s2054_s7 + $0x8] sm:$0xff]   ;;  %v1624_v15 = vld [vmem:[%s2054_s7 + $0x10] sm:$0xff]  }
  0x20   : > { %v1616_v7 = vld [vmem:[%s2054_s7] sm:$0xff]   ;;  %v1621_v12 = vld [vmem:[%s2054_s7 + $0x88] sm:$0xff]   ;;  %v1625_v16 = vld [vmem:[%s2054_s7 + $0x90] sm:$0xff]  }
  0x21   : > { %578 = vmatpush1.bf16.msra.mxu0 %v1558_v27  ;;  %619 = vmatpush1.bf16.msra.mxu1 %v1559_v28  ;;  %v1617_v8 = vld [vmem:[%s2054_s7 + $0x80] sm:$0xff]   ;;  %v1626_v17 = vld [vmem:[%s2054_s7 + $0x58] sm:$0xff]   ;;  %v1634_v25 = vld [vmem:[%s2054_s7 + $0x68] sm:$0xff]  }
  0x22   : > { %579 = vmatprep.subr.bf16.mxu0 %v1560_v29  ;;  %620 = vmatprep.subr.bf16.mxu1 %v1562_v30  ;;  %v1627_v18 = vld [vmem:[%s2054_s7 + $0xd8] sm:$0xff]   ;;  %v1630_v21 = vld [vmem:[%s2054_s7 + $0x60] sm:$0xff]   ;;  %v1635_v26 = vld [vmem:[%s2054_s7 + $0xe8] sm:$0xff]  }
  0x23   : > { %v1628_v19 = vld [vmem:[%s2054_s7 + $0x18] sm:$0xff]   ;;  %v1631_v22 = vld [vmem:[%s2054_s7 + $0xe0] sm:$0xff]   ;;  %v1636_v27 = vld [vmem:[%s2054_s7 + $0x28] sm:$0xff]  }
  0x24   : > { %v1629_v20 = vld [vmem:[%s2054_s7 + $0x98] sm:$0xff]   ;;  %v1632_v23 = vld [vmem:[%s2054_s7 + $0x20] sm:$0xff]   ;;  %v1637_v28 = vld [vmem:[%s2054_s7 + $0xa8] sm:$0xff]  }
  0x25   : > { %580 = vmatpush1.bf16.msra.mxu0 %v1564_v31  ;;  %621 = vmatpush1.bf16.msra.mxu1 %v1565_v32  ;;  %v1633_v24 = vld [vmem:[%s2054_s7 + $0xa0] sm:$0xff]   ;;  %v1638_v29 = vld [vmem:[%s2054_s7 + $0x70] sm:$0xff]   ;;  %v1642_v33 = vld [vmem:[%s2054_s7 + $0x78] sm:$0xff]  }
  0x26   : > { %807 = vmatprep.subr.bf16.mxu0 %v1568_v34  ;;  %848 = vmatprep.subr.bf16.mxu1 %v1571_v35  ;;  %v1639_v30 = vld [vmem:[%s2054_s7 + $0xf0] sm:$0xff]   ;;  %v1643_v34 = vld [vmem:[%s2054_s7 + $0xf8] sm:$0xff]  }
  0x27   : > { %v1640_v31 = vld [vmem:[%s2054_s7 + $0x30] sm:$0xff]   ;;  %v1644_v35 = vld [vmem:[%s2054_s7 + $0x38] sm:$0xff]  }
  0x28   : > { %598 = vmatmul.mubr.bf16.vlgmr.msra.gmra.mrb[0].mxu0 %v372_v36  ;;  %639 = vmatmul.mubr.bf16.vlgmr.msra.gmra.mrb[0].mxu1 %v372_v36  ;;  %v1641_v32 = vld [vmem:[%s2054_s7 + $0xb0] sm:$0xff]   ;;  %v1645_v36 = vld [vmem:[%s2054_s7 + $0xb8] sm:$0xff]  }
  0x29   : > { %808 = vmatpush1.bf16.msra.mxu0 %v1566_v37  ;;  %849 = vmatpush1.bf16.msra.mxu1 %v1569_v38 }
  0x2a   : > { %809 = vmatprep.subr.bf16.mxu0 %v1574_v39  ;;  %850 = vmatprep.subr.bf16.mxu1 %v1577_v40 }
  0x2b   : > { %839 = vmatprep.mubr.bf16.mxu0 %v1670_v2  ;;  %880 = vmatprep.mubr.bf16.mxu1 %v1670_v2  ;;  %v1611_v2 = vld [vmem:[%s2051_s4 + $0xe8] ss:$16 sps:$4 sm:$0xff]  }
  0x2d   : > { %810 = vmatpush1.bf16.msra.mxu0 %v1572_v41  ;;  %851 = vmatpush1.bf16.msra.mxu1 %v1575_v42 }
  0x2e   : > { %811 = vmatprep.subr.bf16.mxu0 %v1580_v43  ;;  %852 = vmatprep.subr.bf16.mxu1 %v1583_v44 }
  0x31   : > { %812 = vmatpush1.bf16.msra.mxu0 %v1578_v45  ;;  %853 = vmatpush1.bf16.msra.mxu1 %v1581_v46  ;;  %v891_v45 = vlaneseq }
  0x32   : > { %813 = vmatprep.subr.bf16.mxu0 %v1586_v47  ;;  %854 = vmatprep.subr.bf16.mxu1 %v1589_v48 }
  0x33   : > { %v892_v46 = vshrl.u32 %v891_v45, 7 }
  0x35   : > { %814 = vmatpush1.bf16.msra.mxu0 %v1584_v49  ;;  %855 = vmatpush1.bf16.msra.mxu1 %v1587_v50  ;;  %v893_v47 = vsub.s32 0, %v892_v46  ;;  %v901_v48 = vsub.s32 2, %v892_v46  ;;  %v889_v49 = vld [vmem:[%s2053_s6] sm:$0xf]  ;;  %v897_v50 = vsub.s32 1, %v892_v46 }
  0x36   : > { %815 = vmatprep.subr.bf16.mxu0 %v1592_v51  ;;  %856 = vmatprep.subr.bf16.mxu1 %v1595_v52  ;;  %v905_v51 = vsub.s32 3, %v892_v46 }
  0x37   : > { %v894_v52 = vrot.slane %v889_v49, %v893_v47 }
  0x39   : > { %816 = vmatpush1.bf16.msra.mxu0 %v1590_v53  ;;  %857 = vmatpush1.bf16.msra.mxu1 %v1593_v54  ;;  %v902_v53 = vrot.slane %v889_v49, %v901_v48 }
  0x3a   : > { %817 = vmatprep.subr.bf16.mxu0 %v1598_v55  ;;  %858 = vmatprep.subr.bf16.mxu1 %v1601_v56  ;;  %v898_v56 = vrot.slane %v889_v49, %v897_v50 }
  0x3d   : > { %818 = vmatpush1.bf16.msra.mxu0 %v1596_v57  ;;  %859 = vmatpush1.bf16.msra.mxu1 %v1599_v58  ;;  %v906_v57 = vrot.slane %v889_v49, %v905_v51 }
  0x3e   : > { %819 = vmatprep.subr.bf16.mxu0 %v1604_v59  ;;  %860 = vmatprep.subr.bf16.mxu1 %v1607_v60 }
  0x41   : > { %820 = vmatpush1.bf16.msra.mxu0 %v1602_v61  ;;  %861 = vmatpush1.bf16.msra.mxu1 %v1605_v62 }
  0x42   : > { %821 = vmatprep.subr.bf16.mxu0 %v1610_v63  ;;  %862 = vmatprep.subr.bf16.mxu1 %v1613_v0 }
  0x45   : > { %822 = vmatpush1.bf16.msra.mxu0 %v1608_v1  ;;  %863 = vmatpush1.bf16.msra.mxu1 %v1611_v2 }
  0x46   : > { %1465 = vmatprep.subr.bf16.mxu0 %v1614_v5  ;;  %1487 = vmatprep.subr.bf16.mxu1 %v1615_v6 }
  0x48   : > { %840 = vmatmul.mubr.bf16.vlgmr.msra.gmra.mrb[4].mxu0 %v338_v4  ;;  %881 = vmatmul.mubr.bf16.vlgmr.msra.gmra.mrb[4].mxu1 %v338_v4 }
  0x49   : > { %1466 = vmatpush3.bf16.msra.mxu0 %v1616_v7  ;;  %1488 = vmatpush3.bf16.msra.mxu1 %v1617_v8 }
  0x4a   : > { %1467 = vmatprep.subr.bf16.mxu0 %v1618_v9  ;;  %1489 = vmatprep.subr.bf16.mxu1 %v1619_v10 }
  0x4d   : > { %1468 = vmatpush3.bf16.msra.mxu0 %v1620_v11  ;;  %1490 = vmatpush3.bf16.msra.mxu1 %v1621_v12 }
  0x4e   : > { %1469 = vmatprep.subr.bf16.mxu0 %v1622_v13  ;;  %1491 = vmatprep.subr.bf16.mxu1 %v1623_v14 }
  0x51   : > { %1470 = vmatpush3.bf16.msra.mxu0 %v1624_v15  ;;  %1492 = vmatpush3.bf16.msra.mxu1 %v1625_v16 }
  0x52   : > { %1471 = vmatprep.subr.bf16.mxu0 %v1626_v17  ;;  %1493 = vmatprep.subr.bf16.mxu1 %v1627_v18 }
  0x55   : > { %1472 = vmatpush3.bf16.msra.mxu0 %v1628_v19  ;;  %1494 = vmatpush3.bf16.msra.mxu1 %v1629_v20 }
  0x56   : > { %1473 = vmatprep.subr.bf16.mxu0 %v1630_v21  ;;  %1495 = vmatprep.subr.bf16.mxu1 %v1631_v22 }
  0x59   : > { %1474 = vmatpush3.bf16.msra.mxu0 %v1632_v23  ;;  %1496 = vmatpush3.bf16.msra.mxu1 %v1633_v24 }
  0x5a   : > { %1475 = vmatprep.subr.bf16.mxu0 %v1634_v25  ;;  %1497 = vmatprep.subr.bf16.mxu1 %v1635_v26 }
  0x5d   : > { %1476 = vmatpush3.bf16.msra.mxu0 %v1636_v27  ;;  %1498 = vmatpush3.bf16.msra.mxu1 %v1637_v28 }
  0x5e   : > { %1477 = vmatprep.subr.bf16.mxu0 %v1638_v29  ;;  %1499 = vmatprep.subr.bf16.mxu1 %v1639_v30 }
  0x61   : > { %1478 = vmatpush3.bf16.msra.mxu0 %v1640_v31  ;;  %1500 = vmatpush3.bf16.msra.mxu1 %v1641_v32 }
  0x62   : > { %1479 = vmatprep.subr.bf16.mxu0 %v1642_v33  ;;  %1501 = vmatprep.subr.bf16.mxu1 %v1643_v34 }
  0x65   : > { %1480 = vmatpush3.bf16.msra.mxu0 %v1644_v35  ;;  %1502 = vmatpush3.bf16.msra.mxu1 %v1645_v36 }
  0xfb   : > { %v599_v37 = vpop.f32.mrb[0].mxu0  ;;  %v640_v38 = vpop.f32.mrb[0].mxu1 }
  0xfc   : > { %v601_v39 = vpop.f32.mrb[1].mxu0  ;;  %v642_v40 = vpop.f32.mrb[1].mxu1 }
  0xfd   : > { %v603_v41 = vpop.f32.mrb[2].mxu0  ;;  %v644_v42 = vpop.f32.mrb[2].mxu1 }
  0xfe   : > { %v604_v43 = vpop.f32.mrb[3].mxu0  ;;  %v645_v44 = vpop.f32.mrb[3].mxu1  ;;  %v1277_v41 = vstv %s1276_s20 }
  0xff   : > { %v1275_v44 = vld [vmem:[%s331_s23] sm:$0xff] }
 0x11b   : > { %v841_v54 = vpop.f32.mrb[4].mxu0  ;;  %v882_v55 = vpop.f32.mrb[4].mxu1 }
 0x11c   : > { %v842_v58 = vadd.f32 %v841_v54, %v599_v37  ;;  %v883_v59 = vadd.f32 %v882_v55, %v640_v38  ;;  %v843_v60 = vpop.f32.mrb[5].mxu0  ;;  %v884_v61 = vpop.f32.mrb[5].mxu1 }
 0x11d   : > { %v844_v62 = vadd.f32 %v843_v60, %v601_v39  ;;  %v885_v63 = vadd.f32 %v884_v61, %v642_v40  ;;  %v845_v0 = vpop.f32.mrb[6].mxu0  ;;  %v886_v1 = vpop.f32.mrb[6].mxu1 }
 0x11e   : > { %v911_v2 = vadd.f32 %v894_v52, %v842_v58  ;;  %v913_v3 = vadd.f32 %v902_v53, %v883_v59  ;;  %v846_v4 = vpop.f32.mrb[7].mxu0  ;;  %v887_v5 = vpop.f32.mrb[7].mxu1 }
 0x11f   : > { %v912_v6 = vadd.f32 %v898_v56, %v844_v62  ;;  %v914_v7 = vadd.f32 %v906_v57, %v885_v63 }
 0x120   : > { %v915_v8 = vsub.f32 0.0, %v911_v2  ;;  %v917_v9 = vsub.f32 0.0, %v913_v3 }
 0x121   : > { %v916_v10 = vsub.f32 0.0, %v912_v6  ;;  %v918_v11 = vsub.f32 0.0, %v914_v7 }
 0x122   : > { %v919_v12 = vmul.f32 1.442695, %v915_v8  ;;  %v923_v13 = vmul.f32 1.442695, %v917_v9 }
 0x123   : > { %v921_v14 = vmul.f32 1.442695, %v916_v10  ;;  %v925_v15 = vmul.f32 1.442695, %v918_v11 }
 0x124   : > { %1646 = vpow2.f32 %v919_v12 }
 0x125   : > { %1648 = vpow2.f32 %v923_v13 }
 0x126   : > { %1650 = vpow2.f32 %v921_v14 }
 0x127   : > { %1652 = vpow2.f32 %v925_v15 }
 0x12e   : > { %v1647_v16 = vpop.eup %1646 }
 0x12f   : > { %v1649_v17 = vpop.eup %1648  ;;  %v927_v18 = vadd.f32 1.0, %v1647_v16 }
 0x130   : > { %v1651_v19 = vpop.eup %1650  ;;  %v929_v20 = vadd.f32 1.0, %v1649_v17 }
 0x131   : > { %v1653_v21 = vpop.eup %1652  ;;  %1654 = vrcp.f32 %v927_v18  ;;  %v928_v22 = vadd.f32 1.0, %v1651_v19 }
 0x132   : > { %1656 = vrcp.f32 %v929_v20  ;;  %v930_v23 = vadd.f32 1.0, %v1653_v21 }
 0x133   : > { %1658 = vrcp.f32 %v928_v22 }
 0x134   : > { %1660 = vrcp.f32 %v930_v23 }
 0x13b   : > { %v1655_v24 = vpop.eup %1654 }
 0x13c   : > { %v1657_v25 = vpop.eup %1656  ;;  %v935_v30 = vpack.c.bf16 %v1655_v24, %v1655_v24 }
 0x13d   : > { %v1659_v26 = vpop.eup %1658  ;;  %v937_v31 = vpack.c.bf16 %v1657_v25, %v1657_v25 }
 0x13e   : > { %v1661_v27 = vpop.eup %1660  ;;  %v936_v28 = vpack.c.bf16 %v1659_v26, %v1659_v26 }
 0x13f   : > { %v938_v29 = vpack.c.bf16 %v1661_v27, %v1661_v27 }
 0x140   : > { %1227 = vmatprep.mubr.bf16.mxu0 %v936_v28 }
 0x141   : > { %1267 = vmatprep.mubr.bf16.mxu1 %v938_v29  ;;  %1228 = vmatmul.mubr.bf16.vlgmr.msra.gmra.mrb[8].mxu0 %v935_v30 }
 0x142   : > { %1268 = vmatmul.mubr.bf16.vlgmr.msra.gmra.mrb[8].mxu1 %v937_v31 }
 0x214   : > { %v1481_v32 = vpop.f32.mrb[8].mxu0 }
 0x215   : > { %v1503_v33 = vpop.f32.mrb[8].mxu1  ;;  %v1482_v34 = vpop.f32.mrb[9].mxu0 }
 0x216   : > { %v1483_v35 = vadd.f32 %v1482_v34, %v1481_v32  ;;  %v1504_v36 = vpop.f32.mrb[9].mxu1  ;;  %v1484_v37 = vpop.f32.mrb[10].mxu0 }
 0x217   : > { %v1505_v38 = vadd.f32 %v1504_v36, %v1503_v33  ;;  %v1506_v39 = vpop.f32.mrb[10].mxu1  ;;  %v1485_v40 = vpop.f32.mrb[11].mxu0 }
 0x218   : > { %v1507_v42 = vpop.f32.mrb[11].mxu1 }
 0x219   : > { %v1270_v43 = vadd.f32 %v1505_v38, %v1483_v35 }
 0x21b   : > { %v1278_v45 = vmul.f32 %v1277_v41, %v1270_v43 }
 0x21d   : > { %v1279_v46 = vadd.f32 %v1278_v45, %v1275_v44 }
 0x21f   : > { %1280 = vst [vmem:[%s335_s30] sm:$0xff] %v1279_v46 }
 0x220 PF: > { %s19_s29 = sadd.s32 1, %s1668_s29  }
 0x221   : > { %p16_p4 = scmp.ge.s32.totalorder %s19_s29, 6  }
 0x223   :  { %18 = sbr.rel (!%p16_p4) target bundleno = 2 (0x2), region = 88 }

</bundles_post_ra>
